<compile_context>
chip_gen: v7x
topology: tpu7x:2x2x1
jax: 0.10.0
libtpu: 0.0.40
codegen_flags: <defaults>
</compile_context>

<pallas_src>
import math

import jax
import jax.numpy as jnp
from jax.experimental import pallas as pl
from jax.experimental.pallas import tpu as pltpu

# ---------------- model hyper-parameters (small, BERT-like) ----------------
VOCAB = 100
B = 2            # batch (sentences)
S = 8            # sequence length
H = 32           # hidden size
NUM_HEADS = 4
HEAD_DIM = H // NUM_HEADS
INTER = 64       # FFN intermediate size
LN_EPS = 1e-12
BS = B * S

# ------------- packed weight-slab layout (rows of a (216,128) slab) --------
def _align8(n):
    return (n + 7) & ~7

R_WQKV = 0                               # (H, 3H)  rows 0:32,   lanes 0:96
R_BQKV = R_WQKV + H                      # (1, 3H)  row  32,     lanes 0:96
R_WO = _align8(R_BQKV + 1)               # (H, H)   rows 40:72,  lanes 0:32
R_W1 = R_WO + H                          # (H, I)   rows 72:104, lanes 0:64
R_B1 = R_W1 + H                          # (1, I)   row  104,    lanes 0:64
R_W2 = _align8(R_B1 + 1)                 # (I, H)   rows 112:176,lanes 0:32
R_HMASK = R_W2 + INTER                   # (4S, H)  rows 176:208,lanes 0:32
R_VEC = R_HMASK + NUM_HEADS * S          # (8, H)   rows 208:216,lanes 0:32
W_ROWS = R_VEC + 8                       # 216
W_COLS = 128

# rows of the packed (8, H) small-vector segment
_EMB_G, _EMB_B, _BO, _LN1_G, _LN1_B, _B2, _LN2_G, _LN2_B = range(8)


def _layernorm(x, gamma, beta):
    mu = jnp.mean(x, axis=-1, keepdims=True)
    d = x - mu
    var = jnp.mean(d * d, axis=-1, keepdims=True)
    return d * jax.lax.rsqrt(var + LN_EPS) * gamma + beta


# ------------------------------- the kernel --------------------------------
def bert_layer_kernel(x_ref, w_ref, o_ref):
    """One grid step = one sentence: (S, H) tokens through the encoder layer."""
    # small packed vectors (LN params / biases), one (8, H) load
    vec = w_ref[R_VEC:R_VEC + 8, 0:H]
    emb_g, emb_b = vec[_EMB_G:_EMB_G + 1], vec[_EMB_B:_EMB_B + 1]
    bo = vec[_BO:_BO + 1]
    ln1_g, ln1_b = vec[_LN1_G:_LN1_G + 1], vec[_LN1_B:_LN1_B + 1]
    b2 = vec[_B2:_B2 + 1]
    ln2_g, ln2_b = vec[_LN2_G:_LN2_G + 1], vec[_LN2_B:_LN2_B + 1]

    # ---- embedding LayerNorm (lookup + pos add done in the wrapper) ----
    x = _layernorm(x_ref[...], emb_g, emb_b)                     # (S, H)

    # ---- fused QKV projection: one (S,H) @ (H,3H) matmul ----
    w_qkv = w_ref[R_WQKV:R_WQKV + H, 0:3 * H]
    b_qkv = w_ref[R_BQKV:R_BQKV + 1, 0:3 * H]
    qkv = jnp.dot(x, w_qkv, preferred_element_type=jnp.float32) + b_qkv
    q = qkv[:, 0:H]
    k = qkv[:, H:2 * H]
    v = qkv[:, 2 * H:3 * H]

    # ---- head-blocked attention (no per-head tensors, no HEAD_DIM=8 ops) ----
    # hmask[h*S + key, d] = 1 iff column d belongs to head h.
    hmask = w_ref[R_HMASK:R_HMASK + NUM_HEADS * S, 0:H]           # (4S, H)
    kblk = jnp.concatenate([k] * NUM_HEADS, axis=0) * hmask       # (4S, H)
    vblk = jnp.concatenate([v] * NUM_HEADS, axis=0) * hmask       # (4S, H)

    # scores[i, h*S + key] = Q_h[i] . K_h[key]  — single K=32 contraction
    s = jnp.einsum("qd,ed->qe", q, kblk,
                   preferred_element_type=jnp.float32)            # (S, 4S)
    s = s * (1.0 / math.sqrt(HEAD_DIM))
    s = s - jnp.max(s, axis=-1, keepdims=True)                    # shared row max
    p = jnp.exp(s)
    # per-(row, head) softmax denominator, broadcast over the head's lanes
    denom = jnp.dot(p, hmask, preferred_element_type=jnp.float32)  # (S, H)
    ctx = jnp.dot(p, vblk, preferred_element_type=jnp.float32) / denom

    # output projection: one (S,H)@(H,H) matmul does the head reduction
    w_o = w_ref[R_WO:R_WO + H, 0:H]
    attn = jnp.dot(ctx, w_o, preferred_element_type=jnp.float32) + bo
    h1 = _layernorm(x + attn, ln1_g, ln1_b)

    # ---- feed-forward (tanh-approx GELU) ----
    w1 = w_ref[R_W1:R_W1 + H, 0:INTER]
    b1 = w_ref[R_B1:R_B1 + 1, 0:INTER]
    w2 = w_ref[R_W2:R_W2 + INTER, 0:H]
    f = jnp.dot(h1, w1, preferred_element_type=jnp.float32) + b1
    f = jax.nn.gelu(f, approximate=True)
    f = jnp.dot(f, w2, preferred_element_type=jnp.float32) + b2
    out = _layernorm(h1 + f, ln2_g, ln2_b)

    o_ref[...] = out.astype(o_ref.dtype)


# ------------------------------ forward glue --------------------------------
def bert_feature_forward(sentence_ids, packed):
    """Equivalent of BertFeature.forward: token ids (B,S) -> features (B,S,H)."""
    ids = sentence_ids.reshape(-1)
    # embedding gather + position add in the wrapper (cheap XLA ops, drops the
    # ids / vocab-table DMAs and the in-kernel one-hot matmul)
    x_in = jnp.take(packed["tok_emb"], ids, axis=0) + jnp.tile(packed["pos_emb"], (B, 1))

    out = pl.pallas_call(
        bert_layer_kernel,
        out_shape=jax.ShapeDtypeStruct((BS, H), jnp.float32),
        grid_spec=pltpu.PrefetchScalarGridSpec(
            num_scalar_prefetch=0,
            grid=(B,),
            in_specs=[
                pl.BlockSpec((S, H), lambda b: (b, 0)),          # per-sentence tokens
                pl.BlockSpec((W_ROWS, W_COLS), lambda b: (0, 0)),  # resident weight slab
            ],
            out_specs=pl.BlockSpec((S, H), lambda b: (b, 0)),
        ),
        compiler_params=pltpu.CompilerParams(
            dimension_semantics=("parallel",)),
    )(x_in, packed["wslab"])
    return out.reshape(B, S, H)


# ----------------------------- parameter init ------------------------------
def init_params(key):
    ks = jax.random.split(key, 20)
    sd = 0.02

    def n(k, shape):
        return jax.random.normal(k, shape, jnp.float32) * sd

    return {
        "tok_emb": n(ks[0], (VOCAB, H)),
        "pos_emb": n(ks[1], (S, H)),
        "emb_ln_g": 1.0 + n(ks[2], (1, H)),
        "emb_ln_b": n(ks[3], (1, H)),
        "wq": n(ks[4], (H, H)), "bq": n(ks[5], (1, H)),
        "wk": n(ks[6], (H, H)), "bk": n(ks[7], (1, H)),
        "wv": n(ks[8], (H, H)), "bv": n(ks[9], (1, H)),
        "wo": n(ks[10], (H, H)), "bo": n(ks[11], (1, H)),
        "ln1_g": 1.0 + n(ks[12], (1, H)), "ln1_b": n(ks[13], (1, H)),
        "w1": n(ks[14], (H, INTER)), "b1": n(ks[15], (1, INTER)),
        "w2": n(ks[16], (INTER, H)), "b2": n(ks[17], (1, H)),
        "ln2_g": 1.0 + n(ks[18], (1, H)), "ln2_b": n(ks[19], (1, H)),
    }


def pack_params(p):
    """One-time host-side packing: all constant operands into ONE f32 slab."""
    w = jnp.zeros((W_ROWS, W_COLS), jnp.float32)
    w = w.at[R_WQKV:R_WQKV + H, 0:3 * H].set(
        jnp.concatenate([p["wq"], p["wk"], p["wv"]], axis=1))
    w = w.at[R_BQKV, 0:3 * H].set(
        jnp.concatenate([p["bq"], p["bk"], p["bv"]], axis=1)[0])
    w = w.at[R_WO:R_WO + H, 0:H].set(p["wo"])
    w = w.at[R_W1:R_W1 + H, 0:INTER].set(p["w1"])
    w = w.at[R_B1, 0:INTER].set(p["b1"][0])
    w = w.at[R_W2:R_W2 + INTER, 0:H].set(p["w2"])

    # head-block mask: row h*S+key owns only head h's HEAD_DIM columns
    head_of_row = jnp.arange(NUM_HEADS * S) // S
    head_of_col = jnp.arange(H) // HEAD_DIM
    hmask = (head_of_row[:, None] == head_of_col[None, :]).astype(jnp.float32)
    w = w.at[R_HMASK:R_HMASK + NUM_HEADS * S, 0:H].set(hmask)

    vec = jnp.concatenate([p["emb_ln_g"], p["emb_ln_b"], p["bo"],
                           p["ln1_g"], p["ln1_b"], p["b2"],
                           p["ln2_g"], p["ln2_b"]], axis=0)        # (8, H)
    w = w.at[R_VEC:R_VEC + 8, 0:H].set(vec)

    return {"tok_emb": p["tok_emb"], "pos_emb": p["pos_emb"], "wslab": w}


# ------------------------- pure-JAX reference ------------------------------
def _reference(sentence_ids, p):
    emb = jnp.take(p["tok_emb"], sentence_ids, axis=0) + p["pos_emb"][None]
    x = _layernorm(emb, p["emb_ln_g"][None], p["emb_ln_b"][None])

    def one(xb):
        q = xb @ p["wq"] + p["bq"]
        k = xb @ p["wk"] + p["bk"]
        v = xb @ p["wv"] + p["bv"]
        outs = []
        for h in range(NUM_HEADS):
            sl = slice(h * HEAD_DIM, (h + 1) * HEAD_DIM)
            sc = (q[:, sl] @ k[:, sl].T) / math.sqrt(HEAD_DIM)
            pr = jax.nn.softmax(sc, axis=-1)
            outs.append(pr @ v[:, sl])
        ctx = jnp.concatenate(outs, axis=-1)
        attn = ctx @ p["wo"] + p["bo"]
        h1 = _layernorm(xb + attn, p["ln1_g"], p["ln1_b"])
        f = jax.nn.gelu(h1 @ p["w1"] + p["b1"], approximate=True)
        f = f @ p["w2"] + p["b2"]
        return _layernorm(h1 + f, p["ln2_g"], p["ln2_b"])

    return jax.vmap(one)(x)


if __name__ == "__main__":
    key = jax.random.PRNGKey(0)
    k_ids, k_params = jax.random.split(key)
    sentence = jax.random.randint(k_ids, (B, S), 0, VOCAB, dtype=jnp.int32)
    params = init_params(k_params)
    packed = pack_params(params)

    feat = jax.jit(bert_feature_forward)(sentence, packed)
    feat = jax.block_until_ready(feat)

    ref = _reference(sentence, params)
    assert feat.shape == (B, S, H)
    assert jnp.allclose(feat, ref, atol=2e-3, rtol=2e-3), "mismatch vs reference"

    print("KERNEL_OK")
</pallas_src>

<mosaic_0001>
module attributes {stable_mosaic.version = 11 : i64} {
  func.func @bert_layer_kernel(%arg0: i32, %arg1: memref<8x32xf32, #tpu.memory_space<vmem>>, %arg2: memref<216x128xf32, #tpu.memory_space<vmem>>, %arg3: memref<8x32xf32, #tpu.memory_space<vmem>>) attributes {dimension_semantics = [#tpu.dimension_semantics<parallel>], iteration_bounds = array<i64: 2>, scalar_prefetch = 0 : i64, scratch_operands = 0 : i64, tpu.core_type = #tpu.core_type<tc>, window_params = [{transform_indices = @transform_0, window_bounds = array<i64: 8, 32>}, {pipeline_mode = #tpu.pipeline_mode<synchronous>, transform_indices = @transform_1, window_bounds = array<i64: 216, 128>}, {transform_indices = @transform_2, window_bounds = array<i64: 8, 32>}]} {
    %c208 = arith.constant 208 : index
    %c0 = arith.constant 0 : index
    %0 = vector.load %arg2[%c208, %c0] : memref<216x128xf32, #tpu.memory_space<vmem>>, vector<8x32xf32>
    %1 = vector.extract_strided_slice %0 {offsets = [0, 0], sizes = [1, 32], strides = [1, 1]} : vector<8x32xf32> to vector<1x32xf32>
    %2 = vector.extract_strided_slice %0 {offsets = [1, 0], sizes = [1, 32], strides = [1, 1]} : vector<8x32xf32> to vector<1x32xf32>
    %3 = vector.extract_strided_slice %0 {offsets = [2, 0], sizes = [1, 32], strides = [1, 1]} : vector<8x32xf32> to vector<1x32xf32>
    %4 = vector.extract_strided_slice %0 {offsets = [3, 0], sizes = [1, 32], strides = [1, 1]} : vector<8x32xf32> to vector<1x32xf32>
    %5 = vector.extract_strided_slice %0 {offsets = [4, 0], sizes = [1, 32], strides = [1, 1]} : vector<8x32xf32> to vector<1x32xf32>
    %6 = vector.extract_strided_slice %0 {offsets = [5, 0], sizes = [1, 32], strides = [1, 1]} : vector<8x32xf32> to vector<1x32xf32>
    %7 = vector.extract_strided_slice %0 {offsets = [6, 0], sizes = [1, 32], strides = [1, 1]} : vector<8x32xf32> to vector<1x32xf32>
    %8 = vector.extract_strided_slice %0 {offsets = [7, 0], sizes = [1, 32], strides = [1, 1]} : vector<8x32xf32> to vector<1x32xf32>
    %c0_0 = arith.constant 0 : index
    %c0_1 = arith.constant 0 : index
    %9 = vector.load %arg1[%c0_0, %c0_1] : memref<8x32xf32, #tpu.memory_space<vmem>>, vector<8x32xf32>
    %cst = arith.constant dense<0.000000e+00> : vector<8xf32>
    %10 = vector.multi_reduction <add>, %9, %cst [1] : vector<8x32xf32> to vector<8xf32>
    %11 = vector.shape_cast %10 : vector<8xf32> to vector<8x1xf32>
    %cst_2 = arith.constant 3.200000e+01 : f32
    %12 = vector.broadcast %cst_2 : f32 to vector<8x1xf32>
    %13 = arith.divf %11, %12 : vector<8x1xf32>
    %14 = vector.broadcast %13 : vector<8x1xf32> to vector<8x32xf32>
    %15 = arith.subf %9, %14 : vector<8x32xf32>
    %16 = arith.mulf %15, %15 : vector<8x32xf32>
    %cst_3 = arith.constant dense<0.000000e+00> : vector<8xf32>
    %17 = vector.multi_reduction <add>, %16, %cst_3 [1] : vector<8x32xf32> to vector<8xf32>
    %18 = vector.shape_cast %17 : vector<8xf32> to vector<8x1xf32>
    %cst_4 = arith.constant 3.200000e+01 : f32
    %19 = vector.broadcast %cst_4 : f32 to vector<8x1xf32>
    %20 = arith.divf %18, %19 : vector<8x1xf32>
    %cst_5 = arith.constant 9.99999996E-13 : f32
    %21 = vector.broadcast %cst_5 : f32 to vector<8x1xf32>
    %22 = arith.addf %20, %21 : vector<8x1xf32>
    %23 = math.rsqrt %22 : vector<8x1xf32>
    %24 = vector.broadcast %23 : vector<8x1xf32> to vector<8x32xf32>
    %25 = arith.mulf %15, %24 : vector<8x32xf32>
    %26 = vector.broadcast %1 : vector<1x32xf32> to vector<8x32xf32>
    %27 = arith.mulf %25, %26 : vector<8x32xf32>
    %28 = vector.broadcast %2 : vector<1x32xf32> to vector<8x32xf32>
    %29 = arith.addf %27, %28 : vector<8x32xf32>
    %c0_6 = arith.constant 0 : index
    %c0_7 = arith.constant 0 : index
    %30 = vector.load %arg2[%c0_6, %c0_7] : memref<216x128xf32, #tpu.memory_space<vmem>>, vector<32x96xf32>
    %c32 = arith.constant 32 : index
    %c0_8 = arith.constant 0 : index
    %31 = vector.load %arg2[%c32, %c0_8] : memref<216x128xf32, #tpu.memory_space<vmem>>, vector<1x96xf32>
    %cst_9 = arith.constant dense<0.000000e+00> : vector<8x96xf32>
    %32 = tpu.matmul %29, %30, %cst_9 {dimension_numbers = #tpu.dot_dimension_numbers<[1], [0], [0], [1], [0, 0, 1, 1], [], []>} : vector<8x32xf32>, vector<32x96xf32>, vector<8x96xf32> -> vector<8x96xf32>
    %33 = vector.broadcast %31 : vector<1x96xf32> to vector<8x96xf32>
    %34 = arith.addf %32, %33 : vector<8x96xf32>
    %35 = vector.extract_strided_slice %34 {offsets = [0, 0], sizes = [8, 32], strides = [1, 1]} : vector<8x96xf32> to vector<8x32xf32>
    %36 = vector.extract_strided_slice %34 {offsets = [0, 32], sizes = [8, 32], strides = [1, 1]} : vector<8x96xf32> to vector<8x32xf32>
    %37 = vector.extract_strided_slice %34 {offsets = [0, 64], sizes = [8, 32], strides = [1, 1]} : vector<8x96xf32> to vector<8x32xf32>
    %c176 = arith.constant 176 : index
    %c0_10 = arith.constant 0 : index
    %38 = vector.load %arg2[%c176, %c0_10] : memref<216x128xf32, #tpu.memory_space<vmem>>, vector<32x32xf32>
    %39 = tpu.concatenate %36, %36, %36, %36 in 0 : vector<8x32xf32>, vector<8x32xf32>, vector<8x32xf32>, vector<8x32xf32> -> vector<32x32xf32>
    %40 = arith.mulf %39, %38 : vector<32x32xf32>
    %41 = tpu.concatenate %37, %37, %37, %37 in 0 : vector<8x32xf32>, vector<8x32xf32>, vector<8x32xf32>, vector<8x32xf32> -> vector<32x32xf32>
    %42 = arith.mulf %41, %38 : vector<32x32xf32>
    "tpu.trace_start"() <{level = 10 : i32, message = "qd,ed->qe"}> : () -> ()
    %cst_11 = arith.constant dense<0.000000e+00> : vector<8x32xf32>
    %43 = tpu.matmul %35, %40, %cst_11 {dimension_numbers = #tpu.dot_dimension_numbers<[1], [1], [0], [0], [0, 0, 1, 0], [], []>} : vector<8x32xf32>, vector<32x32xf32>, vector<8x32xf32> -> vector<8x32xf32>
    "tpu.trace_stop"() : () -> ()
    %cst_12 = arith.constant 0.353553385 : f32
    %44 = vector.broadcast %cst_12 : f32 to vector<8x32xf32>
    %45 = arith.mulf %43, %44 : vector<8x32xf32>
    %cst_13 = arith.constant dense<0xFF800000> : vector<8xf32>
    %46 = vector.multi_reduction <maximumf>, %45, %cst_13 [1] : vector<8x32xf32> to vector<8xf32>
    %47 = vector.shape_cast %46 : vector<8xf32> to vector<8x1xf32>
    %48 = vector.broadcast %47 : vector<8x1xf32> to vector<8x32xf32>
    %49 = arith.subf %45, %48 : vector<8x32xf32>
    %50 = math.exp %49 : vector<8x32xf32>
    %cst_14 = arith.constant dense<0.000000e+00> : vector<8x32xf32>
    %51 = tpu.matmul %50, %38, %cst_14 {dimension_numbers = #tpu.dot_dimension_numbers<[1], [0], [0], [1], [0, 0, 1, 1], [], []>} : vector<8x32xf32>, vector<32x32xf32>, vector<8x32xf32> -> vector<8x32xf32>
    %cst_15 = arith.constant dense<0.000000e+00> : vector<8x32xf32>
    %52 = tpu.matmul %50, %42, %cst_15 {dimension_numbers = #tpu.dot_dimension_numbers<[1], [0], [0], [1], [0, 0, 1, 1], [], []>} : vector<8x32xf32>, vector<32x32xf32>, vector<8x32xf32> -> vector<8x32xf32>
    %53 = arith.divf %52, %51 : vector<8x32xf32>
    %c40 = arith.constant 40 : index
    %c0_16 = arith.constant 0 : index
    %54 = vector.load %arg2[%c40, %c0_16] : memref<216x128xf32, #tpu.memory_space<vmem>>, vector<32x32xf32>
    %cst_17 = arith.constant dense<0.000000e+00> : vector<8x32xf32>
    %55 = tpu.matmul %53, %54, %cst_17 {dimension_numbers = #tpu.dot_dimension_numbers<[1], [0], [0], [1], [0, 0, 1, 1], [], []>} : vector<8x32xf32>, vector<32x32xf32>, vector<8x32xf32> -> vector<8x32xf32>
    %56 = vector.broadcast %3 : vector<1x32xf32> to vector<8x32xf32>
    %57 = arith.addf %55, %56 : vector<8x32xf32>
    %58 = arith.addf %29, %57 : vector<8x32xf32>
    %cst_18 = arith.constant dense<0.000000e+00> : vector<8xf32>
    %59 = vector.multi_reduction <add>, %58, %cst_18 [1] : vector<8x32xf32> to vector<8xf32>
    %60 = vector.shape_cast %59 : vector<8xf32> to vector<8x1xf32>
    %cst_19 = arith.constant 3.200000e+01 : f32
    %61 = vector.broadcast %cst_19 : f32 to vector<8x1xf32>
    %62 = arith.divf %60, %61 : vector<8x1xf32>
    %63 = vector.broadcast %62 : vector<8x1xf32> to vector<8x32xf32>
    %64 = arith.subf %58, %63 : vector<8x32xf32>
    %65 = arith.mulf %64, %64 : vector<8x32xf32>
    %cst_20 = arith.constant dense<0.000000e+00> : vector<8xf32>
    %66 = vector.multi_reduction <add>, %65, %cst_20 [1] : vector<8x32xf32> to vector<8xf32>
    %67 = vector.shape_cast %66 : vector<8xf32> to vector<8x1xf32>
    %cst_21 = arith.constant 3.200000e+01 : f32
    %68 = vector.broadcast %cst_21 : f32 to vector<8x1xf32>
    %69 = arith.divf %67, %68 : vector<8x1xf32>
    %cst_22 = arith.constant 9.99999996E-13 : f32
    %70 = vector.broadcast %cst_22 : f32 to vector<8x1xf32>
    %71 = arith.addf %69, %70 : vector<8x1xf32>
    %72 = math.rsqrt %71 : vector<8x1xf32>
    %73 = vector.broadcast %72 : vector<8x1xf32> to vector<8x32xf32>
    %74 = arith.mulf %64, %73 : vector<8x32xf32>
    %75 = vector.broadcast %4 : vector<1x32xf32> to vector<8x32xf32>
    %76 = arith.mulf %74, %75 : vector<8x32xf32>
    %77 = vector.broadcast %5 : vector<1x32xf32> to vector<8x32xf32>
    %78 = arith.addf %76, %77 : vector<8x32xf32>
    %c72 = arith.constant 72 : index
    %c0_23 = arith.constant 0 : index
    %79 = vector.load %arg2[%c72, %c0_23] : memref<216x128xf32, #tpu.memory_space<vmem>>, vector<32x64xf32>
    %c104 = arith.constant 104 : index
    %c0_24 = arith.constant 0 : index
    %80 = vector.load %arg2[%c104, %c0_24] : memref<216x128xf32, #tpu.memory_space<vmem>>, vector<1x64xf32>
    %c112 = arith.constant 112 : index
    %c0_25 = arith.constant 0 : index
    %81 = vector.load %arg2[%c112, %c0_25] : memref<216x128xf32, #tpu.memory_space<vmem>>, vector<64x32xf32>
    %cst_26 = arith.constant dense<0.000000e+00> : vector<8x64xf32>
    %82 = tpu.matmul %78, %79, %cst_26 {dimension_numbers = #tpu.dot_dimension_numbers<[1], [0], [0], [1], [0, 0, 1, 1], [], []>} : vector<8x32xf32>, vector<32x64xf32>, vector<8x64xf32> -> vector<8x64xf32>
    %83 = vector.broadcast %80 : vector<1x64xf32> to vector<8x64xf32>
    %84 = arith.addf %82, %83 : vector<8x64xf32>
    %85 = arith.mulf %84, %84 : vector<8x64xf32>
    %86 = arith.mulf %84, %85 : vector<8x64xf32>
    %cst_27 = arith.constant 4.471500e-02 : f32
    %87 = vector.broadcast %cst_27 : f32 to vector<8x64xf32>
    %88 = arith.mulf %87, %86 : vector<8x64xf32>
    %89 = arith.addf %84, %88 : vector<8x64xf32>
    %cst_28 = arith.constant 0.797884583 : f32
    %90 = vector.broadcast %cst_28 : f32 to vector<8x64xf32>
    %91 = arith.mulf %90, %89 : vector<8x64xf32>
    %92 = math.tanh %91 : vector<8x64xf32>
    %cst_29 = arith.constant 1.000000e+00 : f32
    %93 = vector.broadcast %cst_29 : f32 to vector<8x64xf32>
    %94 = arith.addf %93, %92 : vector<8x64xf32>
    %cst_30 = arith.constant 5.000000e-01 : f32
    %95 = vector.broadcast %cst_30 : f32 to vector<8x64xf32>
    %96 = arith.mulf %95, %94 : vector<8x64xf32>
    %97 = arith.mulf %84, %96 : vector<8x64xf32>
    %cst_31 = arith.constant dense<0.000000e+00> : vector<8x32xf32>
    %98 = tpu.matmul %97, %81, %cst_31 {dimension_numbers = #tpu.dot_dimension_numbers<[1], [0], [0], [1], [0, 0, 1, 1], [], []>} : vector<8x64xf32>, vector<64x32xf32>, vector<8x32xf32> -> vector<8x32xf32>
    %99 = vector.broadcast %6 : vector<1x32xf32> to vector<8x32xf32>
    %100 = arith.addf %98, %99 : vector<8x32xf32>
    %101 = arith.addf %78, %100 : vector<8x32xf32>
    %cst_32 = arith.constant dense<0.000000e+00> : vector<8xf32>
    %102 = vector.multi_reduction <add>, %101, %cst_32 [1] : vector<8x32xf32> to vector<8xf32>
    %103 = vector.shape_cast %102 : vector<8xf32> to vector<8x1xf32>
    %cst_33 = arith.constant 3.200000e+01 : f32
    %104 = vector.broadcast %cst_33 : f32 to vector<8x1xf32>
    %105 = arith.divf %103, %104 : vector<8x1xf32>
    %106 = vector.broadcast %105 : vector<8x1xf32> to vector<8x32xf32>
    %107 = arith.subf %101, %106 : vector<8x32xf32>
    %108 = arith.mulf %107, %107 : vector<8x32xf32>
    %cst_34 = arith.constant dense<0.000000e+00> : vector<8xf32>
    %109 = vector.multi_reduction <add>, %108, %cst_34 [1] : vector<8x32xf32> to vector<8xf32>
    %110 = vector.shape_cast %109 : vector<8xf32> to vector<8x1xf32>
    %cst_35 = arith.constant 3.200000e+01 : f32
    %111 = vector.broadcast %cst_35 : f32 to vector<8x1xf32>
    %112 = arith.divf %110, %111 : vector<8x1xf32>
    %cst_36 = arith.constant 9.99999996E-13 : f32
    %113 = vector.broadcast %cst_36 : f32 to vector<8x1xf32>
    %114 = arith.addf %112, %113 : vector<8x1xf32>
    %115 = math.rsqrt %114 : vector<8x1xf32>
    %116 = vector.broadcast %115 : vector<8x1xf32> to vector<8x32xf32>
    %117 = arith.mulf %107, %116 : vector<8x32xf32>
    %118 = vector.broadcast %7 : vector<1x32xf32> to vector<8x32xf32>
    %119 = arith.mulf %117, %118 : vector<8x32xf32>
    %120 = vector.broadcast %8 : vector<1x32xf32> to vector<8x32xf32>
    %121 = arith.addf %119, %120 : vector<8x32xf32>
    %c0_37 = arith.constant 0 : index
    %c0_38 = arith.constant 0 : index
    %122 = vector.load %arg3[%c0_37, %c0_38] : memref<8x32xf32, #tpu.memory_space<vmem>>, vector<8x32xf32>
    tpu.vector_store %arg3[%c0_37, %c0_38], %121 {strides = array<i32>} : memref<8x32xf32, #tpu.memory_space<vmem>>, vector<8x32xf32>,
    return
  }
  func.func @transform_0(%arg0: i32) -> (i32, i32) {
    %c0_i32 = arith.constant 0 : i32
    %c0_i32_0 = arith.constant 0 : i32
    return %arg0, %c0_i32 : i32, i32
  }
  func.func @transform_1(%arg0: i32) -> (i32, i32) {
    %c0_i32 = arith.constant 0 : i32
    %c0_i32_0 = arith.constant 0 : i32
    %c0_i32_1 = arith.constant 0 : i32
    return %c0_i32, %c0_i32_0 : i32, i32
  }
  func.func @transform_2(%arg0: i32) -> (i32, i32) {
    %c0_i32 = arith.constant 0 : i32
    %c0_i32_0 = arith.constant 0 : i32
    return %arg0, %c0_i32 : i32, i32
  }
}

</mosaic_0001>

<bundles_post_ra>
// kernel: bert_feature_forward.1
= control target key start
LH: loop header
LB: loop body
LE: loop exit
PB: predicated region body
PF: predicated region fallthrough
CT: control target
= control target key end

     0   :  { %7 = vsyncpa [#allocation3], 0  ;;  %s1546_s0 = inlined_call_operand.vmem [shape: f32[16,32], index: 0, kind: input, shape index: {}]   ;;  %s1547_s1 = inlined_call_operand.vmem [shape: f32[216,128], index: 1, kind: input, shape index: {}]   ;;  %s1548_s2 = inlined_call_operand.hbm [shape: f32[16,32], index: 2, kind: output, shape index: {}]  }
   0x1   :  { %9 = vsyncpa [#allocation3 + $0x1], 0  ;;  %s1289_s9 = smov 0   ;;  %s1291_s10 = smov 0  }
   0x2   :  { %s1293_s11 = smov 0   ;;  %s1295_s12 = smov 0  }
   0x3 LB: > { %s1310_s13 = sadd.s32 4294967295, %s1265_s12   ;;  %s929_s14 = sadd.s32 4294967294, %s1265_s12   ;;  %s1265_s12 = sphi %s1295_s12, %s1554_s12   ;;  %s1261_s11 = sphi %s1293_s11, %s1553_s11   ;;  %s1257_s10 = sphi %s1291_s10, %s1552_s10   ;;  %s1253_s9 = sphi %s1289_s9, %s1551_s9  }
   0x4   : > { %s1314_s15 = sadd.s32 1, %s1265_s12   ;;  %s69_s16 = sadd.s32 1, %s1261_s11 }
   0x5   : > { %s66_s17 = ssub.s32 %s1265_s12, %s1314_s15  ;;  %p79_p0 = scmp.ne.s32.totalorder %s1261_s11, %s1257_s10 }
   0x6   : > { %p67_p1 = scmp.eq.s32.totalorder %s66_s17, 0  ;;  %p80_p2 = scmp.eq.s32.totalorder %s1310_s13, 1 }
   0x7   : > { %p85_p3 = scmp.ne.s32.totalorder %s1257_s10, %s1253_s9  ;;  %p86_p4 = scmp.eq.s32.totalorder %s929_s14, 1 }
   0x8   : > { %s1325_s18 = scalar_select %p67_p1, %s1261_s11, %s69_s16  }
   0x9   : > { %p1327_p5 = por %p80_p2, %p79_p0  ;;  %p1331_p6 = por %p86_p4, %p85_p3 }
   0xa   : > { %p932_p7 = scmp.ge.s32.totalorder %s1265_s12, 1  ;;  %p114_p8 = scmp.lt.s32.totalorder %s1265_s12, 3 }
   0xc   : > { %p115_p9 = pnand %p932_p7, %p114_p8 }
   0xd   : > { %p135_p10 = scmp.lt.s32.totalorder (!%p115_p9), %s1310_s13, 1  ;;  %vm141_vm0 = vcmask (!%p115_p9), 261120   ;;  %v166_v7 = vld [vmem:[%s1547_s1] sm:$0xff] (!%p115_p9)  ;;  %v167_v8 = vld [vmem:[%s1547_s1 + $0x8] sm:$0xff] (!%p115_p9)  ;;  %v168_v9 = vld [vmem:[%s1547_s1 + $0x10] sm:$0xff] (!%p115_p9)  ;;  %v1267_v10 = vmov (!%p115_p9), 0.0|0.0   ;;  %v156_v21 = vlaneseq (!%p115_p9) }
   0xe   : > { %118 = sbr.rel (%p115_p9) target bundleno = 2601 (0xa29), region = 28  ;;  %1076 = vmatprep.subr.bf16.mxu0 (!%p115_p9), %v1267_v10  ;;  %v1077_v11 = vpack.c.bf16 (!%p115_p9), %v167_v8, %v166_v7  ;;  %v169_v12 = vld [vmem:[%s1547_s1 + $0x18] sm:$0xff] (!%p115_p9)  ;;  %vm1268_vm1 = vmmov (!%p115_p9), 0   ;;  %v1269_v13 = vmov (!%p115_p9), 0.0   ;;  %1082 = vmatprep.subr.bf16.mxu1 (!%p115_p9), %v1267_v10  ;;  %v248_v15 = vld [vmem:[%s1547_s1 + $0xb0] sm:$0xff] (!%p115_p9)  ;;  %v250_v16 = vld [vmem:[%s1547_s1 + $0xc0] sm:$0xff] (!%p115_p9) }
   0xf   : > { %999 = vmatprep.mubr.msk.f32.mxu0 (!%p115_p9), %vm1268_vm1, %v1269_v13  ;;  %1010 = vmatprep.mubr.msk.f32.mxu1 (!%p115_p9), %vm1268_vm1, %v1269_v13  ;;  %v1080_v14 = vpack.c.bf16 (!%p115_p9), %v169_v12, %v168_v9  ;;  %s1270_s16 = smov (!%p115_p9), 32   ;;  %v249_v17 = vld [vmem:[%s1547_s1 + $0xb8] sm:$0xff] (!%p115_p9)  ;;  %v251_v18 = vld [vmem:[%s1547_s1 + $0xc8] sm:$0xff] (!%p115_p9)  ;;  %s1271_s24 = smov (!%p115_p9), 64   ;;  %v1377_v23 = vshrl.u32 (!%p115_p9), %v156_v21, 7  ;;  %v1383_v25 = vld [vmem:[%s1547_s1 + $0xd0] sm:$0xff] (!%p115_p9) }
  0x10   : > { %1078 = vmatpush3.bf16.msra.mxu0 (!%p115_p9), %v1077_v11  ;;  %256 = vrot.lane.b32.xlu1 (!%p115_p9), %v248_v15, %s1270_s16  ;;  %v1091_v32 = vpack.c.bf16 (!%p115_p9), %v249_v17, %v248_v15  ;;  %v1094_v34 = vpack.c.bf16 (!%p115_p9), %v251_v18, %v250_v16  ;;  %v935_v37 = vld [vmem:[%s1547_s1 + $0x20] ss:$0 sm:$0xff] (!%p115_p9)  ;;  %s1272_s29 = smov (!%p115_p9), 96   ;;  %vm1084_vm2 = vmpackc.low (!%p115_p9), %vm141_vm0, %vm141_vm0  ;;  %v549_v21 = vld [vmem:[%s1547_s1 + $0x28] sm:$0xff] (!%p115_p9)  ;;  %vm757_vm3 = vcmask (!%p115_p9), 523264   ;;  %s132_s26 = sand.u32 (!%p115_p9), 1, %s1257_s10  }
  0x11   : > { %1079 = vmatprep.subr.bf16.mxu0 (!%p115_p9), %v1267_v10  ;;  %v158_v24 = vsub.s32 (!%p115_p9), 0, %v1377_v23  ;;  %v163_v26 = vsub.s32 (!%p115_p9), 1, %v1377_v23  ;;  %s933_s27 = sshll.u32 (!%p115_p9), %s132_s26, 3  ;;  %s949_s28 = sshll.u32 (!%p115_p9), %s1310_s13, 7 }
  0x12   : > { %s1503_s5 = scalar_lea.hbm (!%p115_p9), %s1548_s2, %s949_s28  ;;  %s857_s6 = scalar_lea.sflag (!%p115_p9), [#allocation3], %s132_s26 }
  0x13   : > { %v159_v27 = vrot.slane (!%p115_p9), %v1383_v25, %v158_v24  ;;  %v164_v30 = vrot.slane (!%p115_p9), %v1383_v25, %v163_v26  ;;  %v551_v26 = vld [vmem:[%s1547_s1 + $0x38] sm:$0xff] (!%p115_p9) }
  0x14   : > { %1081 = vmatpush3.bf16.msra.mxu0 (!%p115_p9), %v1080_v14  ;;  %258 = vrot.lane.b32.xlu1 (!%p115_p9), %v249_v17, %s1270_s16 }
  0x15   : > { %s136_s21 = scalar_select %p135_p10, %s1310_s13, 1  ;;  %1090 = vmatprep.subr.bf16.mxu0 %v1267_v10 }
  0x16   : > { %s1273_s13 = smov [#allocation2]  }
  0x17   : > { %s934_s22 = sshll.u32 %s136_s21, 3  ;;  %s1207_s8 = sshll.u32 %s1273_s13, 4  ;;  %s1208_s8 = int_to_ptr.vmem [resolvable:$false] %s1207_s8 }
  0x18   : > { %s138_s25 = scalar_lea.vmem %s1546_s0, %s934_s22  ;;  %262 = vrot.lane.b32.xlu1 %v251_v18, %s1270_s16  ;;  %s1209_s14 = scalar_lea.vmem %s1208_s8, 256 }
  0x19   : > { %v140_v0 = vld [vmem:[%s138_s25] sm:$0xff] }
  0x1a   : > { %v142_v1 = vsel %vm141_vm0, %v140_v0, 0.0 }
  0x1b   : > { %143 = vadd.xlane.f32.xlu0 %v142_v1 }
  0x82   : > { %v257_v35 = vpop.permute.xlu1 %256 }
  0x86   : > { %v259_v36 = vpop.permute.xlu1 %258 }
  0x8a   : > { %v263_v41 = vpop.permute.xlu1 %262 }
  0xa8   : > { %v144_v2 = vpop.xlane.xlu0 %143 }
  0xa9   : > { %v146_v3 = vmul.f32 0.03125, %v144_v2 }
  0xab   : > { %v147_v4 = vsub.f32 %v140_v0, %v146_v3 }
  0xad   : > { %v148_v5 = vmul.f32 %v147_v4, %v147_v4 }
  0xaf   : > { %v149_v6 = vsel %vm141_vm0, %v148_v5, 0.0 }
  0xb0   : > { %150 = vadd.xlane.f32.xlu0 %v149_v6 }
  0xc6   : > { %260 = vrot.lane.b32.xlu0 %v250_v16, %s1270_s16 }
  0xca   : > { %278 = vrot.lane.b32.xlu0 %v251_v18, %s1271_s24 }
 0x13d   : > { %v151_v19 = vpop.xlane.xlu0 %150 }
 0x13e   : > { %v152_v20 = vmul.f32 0.03125, %v151_v19 }
 0x140   : > { %v153_v22 = vadd.f32 1e-12, %v152_v20 }
 0x141   : > { %v261_v44 = vpop.permute.xlu0 %260 }
 0x142   : > { %1191 = vrsqrt.f32 %v153_v22  ;;  %v550_v22 = vld [vmem:[%s1547_s1 + $0x30] sm:$0xff] }
 0x143   : > { %v1103_v24 = vpack.c.bf16 %v550_v22, %v549_v21 }
 0x145   : > { %v279_v61 = vpop.permute.xlu0 %278 }
 0x14c   : > { %v1192_v28 = vpop.eup %1191 }
 0x14d   : > { %v155_v29 = vmul.f32 %v1192_v28, %v147_v4 }
 0x14f   : > { %v160_v31 = vmul.f32 %v159_v27, %v155_v29  ;;  %v552_v27 = vld [vmem:[%s1547_s1 + $0x40] sm:$0xff] }
 0x150   : > { %v1106_v28 = vpack.c.bf16 %v552_v27, %v551_v26  ;;  %v755_v27 = vsub.s32 5, %v1377_v23 }
 0x151   : > { %v1388_v33 = vadd.f32 %v164_v30, %v160_v31 }
 0x153   : > { %1000 = vmatmul.mubr.msk.f32.vlgmr.msra.gmra.mrb[0].mxu0 %vm141_vm0, %v1388_v33 }
 0x154   : > { %1092 = vmatpush3.bf16.msra.mxu0 %v1091_v32  ;;  %1021 = vmatprep.mubr.msk.f32.mxu0 %vm1268_vm1, %v1269_v13 }
 0x155   : > { %1093 = vmatprep.subr.bf16.mxu0 %v1267_v10 }
 0x158   : > { %1095 = vmatpush3.bf16.msra.mxu0 %v1094_v34 }
 0x159   : > { %1096 = vmatprep.subr.bf16.mxu0 %v1267_v10 }
 0x226   : > { %v244_v38 = vpop.f32.mrb[0].mxu0 }
 0x227   : > { %v245_v39 = vadd.f32 %v935_v37, %v244_v38  ;;  %v1001_v40 = vpop.f32.mrb[1].mxu0 }
 0x229   : > { %v268_v42 = vmul.f32 %v257_v35, %v245_v39  ;;  %v269_v43 = vmul.f32 %v259_v36, %v245_v39  ;;  %v270_v45 = vmul.f32 %v261_v44, %v245_v39  ;;  %v271_v46 = vmul.f32 %v263_v41, %v245_v39 }
 0x22a   : > { %v287_v0 = vmul.f32 %v279_v61, %v245_v39  ;;  %v555_v36 = vsub.s32 2, %v1377_v23 }
 0x22b   : > { %v1171_v47 = vpack.i.bf16 %v269_v43, %v268_v42  ;;  %v1176_v48 = vpack.i.bf16 %v271_v46, %v270_v45 }
 0x22c   : > { %v556_v37 = vrot.slane %v1383_v25, %v555_v36 }
 0x22d   : > { %1172 = vrot.lane.b32.xlu1 %v1171_v47, %s1272_s29 }
 0x231   : > { %1177 = vrot.lane.b32.xlu1 %v1176_v48, %s1272_s29  ;;  %v655_v48 = vld [vmem:[%s1547_s1 + $0x50] sm:$0xff]  ;;  %s134_s29 = scalar_lea.vmem [#allocation2], %s933_s27 }
 0x232   : > { %s870_s30 = sshll.u32 %s134_s29, 4  ;;  %s1505_s30 = int_to_ptr.vmem [resolvable:$true] %s870_s30 }
 0x233   : > { %s1203_s7 = scalar_lea.vmem %s1505_s30, 128  ;;  %p1210_p0 = scmp.lt.s32.totalorder %s1505_s30, %s1208_s8 }
 0x234   : > { %p1204_p11 = scmp.ne.s32.totalorder %s1505_s30, %s1203_s7  ;;  %p1211_p1 = scmp.lt.s32.totalorder %s1209_s14, %s1203_s7 }
 0x235   : > { %272 = vrot.lane.b32.xlu1 %v248_v15, %s1271_s24 }
 0x236   : > { %p1205_p12 = pnand %p1204_p11, %p1327_p5  ;;  %p1212_p2 = por %p1211_p1, %p1210_p0 }
 0x238   : > { %p1206_p13 = pneg %p1205_p12 }
 0x239   : > { %274 = vrot.lane.b32.xlu1 %v249_v17, %s1271_s24 }
 0x23a   : > { %p1213_p3 = pnand %p1212_p2, %p1206_p13 }
 0x23d   : > { %276 = vrot.lane.b32.xlu1 %v250_v16, %s1271_s24 }
 0x29f   : > { %v1173_v49 = vpop.permute.xlu1 %1172 }
 0x2a0   : > { %v1175_v50 = vunpack.i.h.bf16 %v1173_v49  ;;  %v1174_v51 = vunpack.i.l.bf16 %v1173_v49 }
 0x2a2   : > { %v1083_v52 = vpack.c.bf16 %v1175_v50, %v1174_v51  ;;  %v657_v50 = vld [vmem:[%s1547_s1 + $0x60] sm:$0xff] }
 0x2a3   : > { %v1178_v53 = vpop.permute.xlu1 %1177 }
 0x2a4   : > { %1085 = vmatpush3.bf16.xpose.msk.msra.mxu1 %vm1084_vm2, %v1083_v52  ;;  %v1180_v54 = vunpack.i.h.bf16 %v1178_v53  ;;  %v1179_v55 = vunpack.i.l.bf16 %v1178_v53 }
 0x2a5   : > { %1086 = vmatprep.subr.bf16.mxu1 %v1267_v10 }
 0x2a6   : > { %v1087_v57 = vpack.c.bf16 %v1180_v54, %v1179_v55  ;;  %v646_v55 = vsub.s32 3, %v1377_v23 }
 0x2a7   : > { %v273_v56 = vpop.permute.xlu1 %272 }
 0x2a8   : > { %v284_v59 = vmul.f32 %v273_v56, %v245_v39  ;;  %v651_v56 = vsub.s32 4, %v1377_v23 }
 0x2ab   : > { %v275_v58 = vpop.permute.xlu1 %274 }
 0x2ac   : > { %v285_v60 = vmul.f32 %v275_v58, %v245_v39  ;;  %1089 = vmatpush3.bf16.xpose.msk.msra.mxu1 %vm1084_vm2, %v1087_v57  ;;  %v647_v57 = vrot.slane %v1383_v25, %v646_v55 }
 0x2ad   : > { %1102 = vmatprep.subr.bf16.mxu1 %v1267_v10 }
 0x2ae   : > { %v1181_v62 = vpack.i.bf16 %v285_v60, %v284_v59  ;;  %v652_v60 = vrot.slane %v1383_v25, %v651_v56 }
 0x2af   : > { %v277_v63 = vpop.permute.xlu1 %276 }
 0x2b0   : > { %v286_v1 = vmul.f32 %v277_v63, %v245_v39  ;;  %1182 = vrot.lane.b32.xlu0 %v1181_v62, %s1271_s24  ;;  %v659_v63 = vld [vmem:[%s1547_s1 + $0x70] sm:$0xff] }
 0x2b2   : > { %v1186_v2 = vpack.i.bf16 %v287_v0, %v286_v1  ;;  %v660_v0 = vld [vmem:[%s1547_s1 + $0x78] sm:$0xff] }
 0x2b3   : > { %1011 = vmatmul.mubr.msk.f32.vlgmr.msra.gmra.mrb[0].mxu1 %vm141_vm0, %v245_v39  ;;  %v1115_v1 = vpack.c.bf16 %v660_v0, %v659_v63 }
 0x2b4   : > { %1187 = vrot.lane.b32.xlu0 %v1186_v2, %s1271_s24  ;;  %1043 = vmatprep.mubr.msk.f32.mxu1 %vm1268_vm1, %v1269_v13  ;;  %v661_v2 = vld [vmem:[%s1547_s1 + $0x80] sm:$0xff] }
 0x2b5   : > { %1104 = vmatpush3.bf16.msra.mxu1 %v1103_v24 }
 0x2b6   : > { %1105 = vmatprep.subr.bf16.mxu1 %v1267_v10 }
 0x2b9   : > { %1107 = vmatpush3.bf16.msra.mxu1 %v1106_v28  ;;  %v756_v28 = vrot.slane %v1383_v25, %v755_v27 }
 0x2ba   : > { %1114 = vmatprep.subr.bf16.mxu1 %v1267_v10 }
 0x322   : > { %v1183_v11 = vpop.permute.xlu0 %1182 }
 0x323   : > { %v1185_v12 = vunpack.i.h.bf16 %v1183_v11  ;;  %v1184_v14 = vunpack.i.l.bf16 %v1183_v11 }
 0x325   : > { %v1097_v17 = vpack.c.bf16 %v1185_v12, %v1184_v14  ;;  %v945_v12 = vld [vmem:[%s1547_s1 + $0x68] ss:$0 sm:$0xff] }
 0x326   : > { %v1188_v15 = vpop.permute.xlu0 %1187 }
 0x327   : > { %v1190_v18 = vunpack.i.h.bf16 %v1188_v15  ;;  %v1189_v19 = vunpack.i.l.bf16 %v1188_v15 }
 0x329   : > { %v1100_v20 = vpack.c.bf16 %v1190_v18, %v1189_v19 }
 0x386   : > { %v377_v3 = vpop.f32.mrb[0].mxu1 }
 0x387   : > { %v381_v4 = vmul.f32 0.35355338, %v377_v3  ;;  %v1012_v5 = vpop.f32.mrb[1].mxu1  ;;  %v662_v3 = vld [vmem:[%s1547_s1 + $0x88] sm:$0xff] }
 0x388   : > { %v663_v5 = vld [vmem:[%s1547_s1 + $0x90] sm:$0xff] }
 0x389   : > { %v382_v6 = vsel %vm141_vm0, %v381_v4, -inf }
 0x38a   : > { %383 = vmax.xlane.f32.xlu1 %v382_v6  ;;  %v664_v6 = vld [vmem:[%s1547_s1 + $0x98] sm:$0xff] }
 0x417   : > { %v384_v7 = vpop.xlane.xlu1 %383 }
 0x418   : > { %v385_v8 = vsub.f32 %v381_v4, %v384_v7  ;;  %v1118_v4 = vpack.c.bf16 %v662_v3, %v661_v2  ;;  %v1121_v7 = vpack.c.bf16 %v664_v6, %v663_v5 }
 0x41a   : > { %v386_v9 = vmul.f32 1.442695, %v385_v8  ;;  %v665_v8 = vld [vmem:[%s1547_s1 + $0xa0] sm:$0xff] }
 0x41c   : > { %1193 = vpow2.f32 %v386_v9  ;;  %v666_v9 = vld [vmem:[%s1547_s1 + $0xa8] sm:$0xff] }
 0x41d   : > { %v1124_v11 = vpack.c.bf16 %v666_v9, %v665_v8 }
 0x426   : > { %v1194_v16 = vpop.eup %1193 }
 0x427   : > { %1022 = vmatmul.mubr.msk.f32.vlgmr.msra.gmra.mrb[2].mxu0 %vm141_vm0, %v1194_v16 }
 0x428   : > { %1098 = vmatpush3.bf16.msra.mxu0 %v1097_v17  ;;  %1032 = vmatprep.mubr.msk.f32.mxu0 %vm1268_vm1, %v1269_v13 }
 0x429   : > { %1099 = vmatprep.subr.bf16.mxu0 %v1267_v10 }
 0x42c   : > { %1101 = vmatpush3.bf16.msra.mxu0 %v1100_v20 }
 0x42d   : > { %1108 = vmatprep.subr.bf16.mxu0 %v1267_v10 }
 0x42f   : > { %1033 = vmatmul.mubr.msk.f32.vlgmr.msra.gmra.mrb[4].mxu0 %vm141_vm0, %v1194_v16 }
 0x430   : > { %1054 = vmatprep.mubr.msk.f32.mxu0 %vm1268_vm1, %v1269_v13 }
 0x4fa   : > { %v457_v29 = vpop.f32.mrb[2].mxu0 }
 0x4fb   : > { %1195 = vrcp.f32 %v457_v29  ;;  %v1023_v30 = vpop.f32.mrb[3].mxu0 }
 0x502   : > { %v543_v31 = vpop.f32.mrb[4].mxu0 }
 0x503   : > { %v1034_v32 = vpop.f32.mrb[5].mxu0 }
 0x505   : > { %v1196_v34 = vpop.eup %1195 }
 0x506   : > { %v548_v35 = vmul.f32 %v1196_v34, %v543_v31 }
 0x508   : > { %1044 = vmatmul.mubr.msk.f32.vlgmr.msra.gmra.mrb[2].mxu1 %vm141_vm0, %v548_v35 }
 0x509   : > { %1073 = vmatprep.mubr.msk.f32.mxu1 %vm1268_vm1, %v1269_v13  ;;  %v654_v13 = vld [vmem:[%s1547_s1 + $0x48] sm:$0xff]  ;;  %1116 = vmatpush3.bf16.msra.mxu1 %v1115_v1 }
 0x50a   : > { %v1109_v49 = vpack.c.bf16 %v655_v48, %v654_v13  ;;  %1117 = vmatprep.subr.bf16.mxu1 %v1267_v10 }
 0x50c   : > { %1110 = vmatpush3.bf16.msra.mxu0 %v1109_v49 }
 0x50d   : > { %1111 = vmatprep.subr.bf16.mxu0 %v1267_v10  ;;  %1119 = vmatpush3.bf16.msra.mxu1 %v1118_v4 }
 0x50e   : > { %1120 = vmatprep.subr.bf16.mxu1 %v1267_v10 }
 0x511   : > { %1122 = vmatpush3.bf16.msra.mxu1 %v1121_v7 }
 0x512   : > { %1123 = vmatprep.subr.bf16.mxu1 %v1267_v10 }
 0x515   : > { %1125 = vmatpush3.bf16.msra.mxu1 %v1124_v11 }
 0x5db   : > { %v626_v38 = vpop.f32.mrb[2].mxu1 }
 0x5dc   : > { %v627_v39 = vadd.f32 %v626_v38, %v556_v37  ;;  %v1045_v40 = vpop.f32.mrb[3].mxu1 }
 0x5de   : > { %v630_v41 = vadd.f32 %v627_v39, %v1388_v33  ;;  %v656_v33 = vld [vmem:[%s1547_s1 + $0x58] sm:$0xff] }
 0x5df   : > { %v1112_v51 = vpack.c.bf16 %v657_v50, %v656_v33 }
 0x5e0   : > { %v631_v42 = vsel %vm141_vm0, %v630_v41, 0.0 }
 0x5e1   : > { %632 = vadd.xlane.f32.xlu0 %v631_v42  ;;  %1113 = vmatpush3.bf16.msra.mxu0 %v1112_v51 }
 0x66e   : > { %v633_v43 = vpop.xlane.xlu0 %632 }
 0x66f   : > { %v634_v44 = vmul.f32 0.03125, %v633_v43  ;;  %v847_v43 = vsub.s32 6, %v1377_v23 }
 0x671   : > { %v635_v45 = vsub.f32 %v630_v41, %v634_v44  ;;  %v852_v44 = vsub.s32 7, %v1377_v23 }
 0x673   : > { %v636_v46 = vmul.f32 %v635_v45, %v635_v45  ;;  %v853_v13 = vrot.slane %v1383_v25, %v852_v44 }
 0x675   : > { %v637_v47 = vsel %vm141_vm0, %v636_v46, 0.0 }
 0x676   : > { %638 = vadd.xlane.f32.xlu1 %v637_v47 }
 0x703   : > { %v639_v52 = vpop.xlane.xlu1 %638 }
 0x704   : > { %v640_v53 = vmul.f32 0.03125, %v639_v52 }
 0x706   : > { %v641_v54 = vadd.f32 1e-12, %v640_v53 }
 0x708   : > { %1197 = vrsqrt.f32 %v641_v54 }
 0x712   : > { %v1198_v58 = vpop.eup %1197 }
 0x713   : > { %v643_v59 = vmul.f32 %v1198_v58, %v635_v45  ;;  %v848_v45 = vrot.slane %v1383_v25, %v847_v43 }
 0x715   : > { %v648_v61 = vmul.f32 %v647_v57, %v643_v59 }
 0x717   : > { %v653_v62 = vadd.f32 %v652_v60, %v648_v61 }
 0x719   : > { %1055 = vmatmul.mubr.msk.f32.vlgmr.msra.gmra.mrb[6].mxu0 %vm141_vm0, %v653_v62 }
 0x7ec   : > { %v740_v14 = vpop.f32.mrb[6].mxu0 }
 0x7ed   : > { %v741_v15 = vadd.f32 %v945_v12, %v740_v14  ;;  %v1056_v16 = vpop.f32.mrb[7].mxu0 }
 0x7ef   : > { %v744_v17 = vmul.f32 %v741_v15, %v741_v15 }
 0x7f1   : > { %v745_v18 = vmul.f32 %v744_v17, %v741_v15 }
 0x7f3   : > { %v746_v10 = vmul.f32 0.044715, %v745_v18 }
 0x7f5   : > { %v747_v19 = vadd.f32 %v746_v10, %v741_v15 }
 0x7f7   : > { %v748_v20 = vmul.f32 0.7978846, %v747_v19 }
 0x7f9   : > { %1199 = vtanh.f32 %v748_v20 }
 0x803   : > { %v1200_v21 = vpop.eup %1199 }
 0x804   : > { %v750_v22 = vadd.f32 1.0, %v1200_v21 }
 0x806   : > { %v751_v24 = vmul.f32 0.5, %v750_v22 }
 0x808   : > { %v752_v26 = vmul.f32 %v751_v24, %v741_v15 }
 0x80a   : > { %1074 = vmatmul.mubr.msk.f32.vlgmr.msra.gmra.mrb[4].mxu1 %vm757_vm3, %v752_v26 }
 0x8dd   : > { %v827_v29 = vpop.f32.mrb[4].mxu1 }
 0x8de   : > { %v828_v30 = vadd.f32 %v827_v29, %v756_v28  ;;  %v1075_v31 = vpop.f32.mrb[5].mxu1 }
 0x8e0   : > { %v831_v32 = vadd.f32 %v828_v30, %v653_v62 }
 0x8e2   : > { %v832_v34 = vsel %vm141_vm0, %v831_v32, 0.0 }
 0x8e3   : > { %833 = vadd.xlane.f32.xlu1 %v832_v34 }
 0x970   : > { %v834_v35 = vpop.xlane.xlu1 %833 }
 0x971   : > { %v835_v36 = vmul.f32 0.03125, %v834_v35 }
 0x973   : > { %v836_v37 = vsub.f32 %v831_v32, %v835_v36 }
 0x975   : > { %v837_v38 = vmul.f32 %v836_v37, %v836_v37 }
 0x977   : > { %v838_v39 = vsel %vm141_vm0, %v837_v38, 0.0 }
 0x978   : > { %839 = vadd.xlane.f32.xlu0 %v838_v39 }
 0xa05   : > { %v840_v40 = vpop.xlane.xlu0 %839 }
 0xa06   : > { %v841_v41 = vmul.f32 0.03125, %v840_v40 }
 0xa08   : > { %v842_v42 = vadd.f32 1e-12, %v841_v41 }
 0xa0a   : > { %1201 = vrsqrt.f32 %v842_v42 }
 0xa14   : > { %v1202_v46 = vpop.eup %1201 }
 0xa15   : > { %v844_v47 = vmul.f32 %v1202_v46, %v836_v37 }
 0xa17   : > { %v849_v48 = vmul.f32 %v848_v45, %v844_v47 }
 0xa19   : > { %v854_v49 = vadd.f32 %v853_v13, %v849_v48 }
 0xa1b   : > { %855 = vst.msk [vmem:[%s134_s29] sm:$0xff] %vm141_vm0, %v854_v49 }
 0xa1c   : > { %1216 = shalt.err (!%p1213_p3)
}
 0xa1d   : > { %s1217_s16 = scalar_lea.hbm %s1503_s5, 128  ;;  %s1221_s22 = scalar_lea.hbm %s1548_s2, 256 }
 0xa1e   : > { %p1218_p4 = scmp.ne.s32.totalorder %s1503_s5, %s1217_s16  ;;  %p1222_p9 = scmp.lt.u32.totalorder %s1503_s5, %s1548_s2 }
 0xa1f   : > { %p1223_p10 = scmp.lt.u32.totalorder %s1221_s22, %s1217_s16  ;;  %p1225_p12 = scmp.lt.u32.totalorder %s1217_s16, %s1503_s5 }
 0xa20   : > { %p1219_p7 = pnand %p1218_p4, %p1327_p5 }
 0xa21   : > { %p1224_p11 = por %p1223_p10, %p1222_p9 }
 0xa22   : > { %p1220_p8 = pneg %p1219_p7 }
 0xa23   : > { %p1226_p13 = por %p1225_p12, %p1224_p11 }
 0xa25   : > { %p1227_p0 = pnand %p1226_p13, %p1220_p8 }
 0xa27   : > { %1230 = shalt.err (!%p1227_p0)
}
 0xa28   : > { %1126 = dma.vmem_to_hbm [thread:$0]  (%p1327_p5), %s1505_s30, 128, %s1503_s5, %s857_s6  }
 0xa29 PF: > { %p1132_p1 = scmp.ge.s32.totalorder %s1265_s12, 2  ;;  %s882_s25 = sand.u32 1, %s1253_s9  }
 0xa2a   : > { %s883_s26 = scalar_lea.sflag [#allocation3], %s882_s25 }
 0xa2b   : > { %p1129_p2 = pnand %p1132_p1, %p1331_p6 }
 0xa2d   : > { %1248 = dma.done.wait (!%p1129_p2), %s883_s26, 128  }
 0xa2e   : > { %1250 = vsyncadd (!%p1129_p2), %s883_s26, 4294967168  ;;  %p12_p3 = scmp.ge.s32.totalorder %s1314_s15, 4   ;;  %s1551_s9 = smov %s1257_s10 }
 0xa2f   : > { %s1552_s10 = smov %s1261_s11  ;;  %s1553_s11 = smov %s1325_s18 }
 0xa30   : > { %s1554_s12 = smov %s1314_s15  ;;  %14 = sbr.rel (!%p12_p3) target bundleno = 3 (0x3), region = 63 }
 0xa37   :  { %888 = vsyncpa [#allocation3], 1 }
 0xa38   :  { %890 = vsyncpa [#allocation3 + $0x1], 1 }

</bundles_post_ra>
